<compile_context>
chip_gen: v6e
topology: v6e:2x2x1
jax: 0.10.0
libtpu: 0.0.40
codegen_flags: <defaults>
</compile_context>

<pallas_src>
import functools

import jax
import jax.numpy as jnp
from jax.experimental import pallas as pl
from jax.experimental.pallas import tpu as pltpu

_LANE = 128            # lane width (last-dim tiling)
_SUBLANE = 8           # sublane width (second-to-last-dim tiling)
_MAX_ROW_TILE = 256    # good for v6e/v7x MXU; drop to 128 when tuning for v5e
_VMEM_LIMIT = 32 * 1024 * 1024  # safe across v5e (128M) / v6e (128M) / v7x (64M)


def _round_up(n, m):
    return ((n + m - 1) // m) * m


def _pick_row_tile(n, max_tile=_MAX_ROW_TILE):
    n8 = _round_up(max(n, 1), _SUBLANE)
    return n8 if n8 <= max_tile else max_tile


def _compiler_params():
    return pltpu.CompilerParams(
        dimension_semantics=("parallel",),
        vmem_limit_bytes=_VMEM_LIMIT,
    )


# ---------------------------------------------------------------------------
# Kernels
# ---------------------------------------------------------------------------
def linear_kernel(x_ref, w_ref, b_ref, o_ref):
    """o = x @ W + b (bf16 operands, f32 accumulate, bf16 out)."""
    acc = jnp.dot(x_ref[...], w_ref[...], preferred_element_type=jnp.float32)
    o_ref[...] = (acc + b_ref[...]).astype(o_ref.dtype)


def sage_conv_kernel(a_ref, h_src_ref, h_dst_ref, wl_ref, bl_ref, wr_ref, o_ref,
                     *, relu):
    """SAGEConv for one tile of destination-node rows.

    a_ref     : [tile_m, N_src]  row-normalized adjacency (mean aggregation)
    h_src_ref : [N_src, H]       source-type embeddings (resident, small graph)
    h_dst_ref : [tile_m, H]      destination-type embeddings (self/root term)
    """
    agg = jnp.dot(a_ref[...], h_src_ref[...], preferred_element_type=jnp.float32)
    out = (jnp.dot(agg.astype(jnp.bfloat16), wl_ref[...],
                   preferred_element_type=jnp.float32)
           + bl_ref[...]
           + jnp.dot(h_dst_ref[...], wr_ref[...],
                     preferred_element_type=jnp.float32))
    if relu:
        out = jnp.maximum(out, 0.0)
    o_ref[...] = out.astype(o_ref.dtype)


def edge_mlp_kernel(src_ref, dst_ref, w1a_ref, w1b_ref, b1_ref, w2_ref, b2_ref,
                    o_ref):
    """Edge classifier: sigmoid(relu([src|dst] @ W1 + b1) @ w2 + b2).

    The final [H,1] matmul is a VPU multiply + lane reduction; the logit is
    broadcast across 128 lanes so the store stays unmasked (lane-dense).
    """
    hidden = (jnp.dot(src_ref[...], w1a_ref[...], preferred_element_type=jnp.float32)
              + jnp.dot(dst_ref[...], w1b_ref[...], preferred_element_type=jnp.float32)
              + b1_ref[...])
    hidden = jnp.maximum(hidden, 0.0)            # ReLU (+ dropout == identity)
    logit = jnp.sum(hidden * w2_ref[...], axis=-1, keepdims=True) + b2_ref[...]
    o_ref[...] = jnp.broadcast_to(jax.nn.sigmoid(logit), o_ref.shape)


# ---------------------------------------------------------------------------
# pallas_call wrappers (row-tiled grids, "parallel" semantics)
# ---------------------------------------------------------------------------
def _linear(x, w, b, *, tile_m):
    n_pad, d_in = x.shape
    h = w.shape[1]
    return pl.pallas_call(
        linear_kernel,
        out_shape=jax.ShapeDtypeStruct((n_pad, h), jnp.bfloat16),
        grid=(n_pad // tile_m,),
        in_specs=[
            pl.BlockSpec((tile_m, d_in), lambda i: (i, 0)),
            pl.BlockSpec((d_in, h), lambda i: (0, 0)),
            pl.BlockSpec((1, h), lambda i: (0, 0)),
        ],
        out_specs=pl.BlockSpec((tile_m, h), lambda i: (i, 0)),
        compiler_params=_compiler_params(),
    )(x, w, b)


def _sage_conv(a, h_src, h_dst, wl, bl, wr, *, relu, tile_m):
    n_dst_pad, n_src_pad = a.shape
    h = wl.shape[1]
    return pl.pallas_call(
        functools.partial(sage_conv_kernel, relu=relu),
        out_shape=jax.ShapeDtypeStruct((n_dst_pad, h), jnp.bfloat16),
        grid=(n_dst_pad // tile_m,),
        in_specs=[
            pl.BlockSpec((tile_m, n_src_pad), lambda i: (i, 0)),
            pl.BlockSpec((n_src_pad, h), lambda i: (0, 0)),
            pl.BlockSpec((tile_m, h), lambda i: (i, 0)),
            pl.BlockSpec((h, h), lambda i: (0, 0)),
            pl.BlockSpec((1, h), lambda i: (0, 0)),
            pl.BlockSpec((h, h), lambda i: (0, 0)),
        ],
        out_specs=pl.BlockSpec((tile_m, h), lambda i: (i, 0)),
        compiler_params=_compiler_params(),
    )(a, h_src, h_dst, wl, bl, wr)


def _edge_mlp(e_src, e_dst, w1a, w1b, b1, w2_row, b2, *, tile_e):
    e_pad, h = e_src.shape
    return pl.pallas_call(
        edge_mlp_kernel,
        out_shape=jax.ShapeDtypeStruct((e_pad, _LANE), jnp.float32),
        grid=(e_pad // tile_e,),
        in_specs=[
            pl.BlockSpec((tile_e, h), lambda i: (i, 0)),
            pl.BlockSpec((tile_e, h), lambda i: (i, 0)),
            pl.BlockSpec((h, h), lambda i: (0, 0)),
            pl.BlockSpec((h, h), lambda i: (0, 0)),
            pl.BlockSpec((1, h), lambda i: (0, 0)),
            pl.BlockSpec((1, h), lambda i: (0, 0)),
            pl.BlockSpec((1, 1), lambda i: (0, 0)),
        ],
        out_specs=pl.BlockSpec((tile_e, _LANE), lambda i: (i, 0)),
        compiler_params=_compiler_params(),
    )(e_src, e_dst, w1a, w1b, b1, w2_row, b2)


# ---------------------------------------------------------------------------
# Parameter padding (lane-dense, bf16 matmul operands, f32 biases)
# ---------------------------------------------------------------------------
def _pad2d(x, rows, cols, dtype):
    return jnp.pad(x, ((0, rows - x.shape[0]), (0, cols - x.shape[1]))).astype(dtype)


def pad_params(params, d_pad, h_pad):
    bf16, f32 = jnp.bfloat16, jnp.float32
    p = {
        "w_mch": _pad2d(params["w_mch"], d_pad, h_pad, bf16),
        "w_mft": _pad2d(params["w_mft"], d_pad, h_pad, bf16),
        "b_mch": _pad2d(params["b_mch"], 1, h_pad, f32),
        "b_mft": _pad2d(params["b_mft"], 1, h_pad, f32),
    }
    for name in ("wl1m", "wr1m", "wl1r", "wr1r",
                 "wl2m", "wr2m", "wl2r", "wr2r", "we1a", "we1b"):
        p[name] = _pad2d(params[name], h_pad, h_pad, bf16)
    for name in ("bl1m", "bl1r", "bl2m", "bl2r", "be1"):
        p[name] = _pad2d(params[name], 1, h_pad, f32)
    # Final [H,1] weight kept in f32 and stored as a [1,H] row for lane reduction.
    p["we2_row"] = _pad2d(params["we2"].T, 1, h_pad, f32)
    p["be2"] = params["be2"].astype(f32)
    return p


# ---------------------------------------------------------------------------
# Forward pass
# ---------------------------------------------------------------------------
def basic_gnn_forward(x_mch, x_mft, edge_src, edge_dst, params):
    """edge_src: MCH indices, edge_dst: MFT indices of ('MCH','match','MFT') edges."""
    n_mch, d_in = x_mch.shape
    n_mft = x_mft.shape[0]
    e = edge_src.shape[0]
    hidden_dim = params["wl1m"].shape[0]

    h_pad = _round_up(hidden_dim, _LANE)
    d_pad = _round_up(d_in, _SUBLANE)
    tile_mch = _pick_row_tile(n_mch)
    tile_mft = _pick_row_tile(n_mft)
    tile_e = _pick_row_tile(e)
    n_mch_pad = _round_up(n_mch, tile_mch)
    n_mft_pad = _round_up(n_mft, tile_mft)
    e_pad = _round_up(e, tile_e)

    pp = pad_params(params, d_pad, h_pad)
    bf16 = jnp.bfloat16

    x_mch_p = jnp.pad(x_mch, ((0, n_mch_pad - n_mch), (0, d_pad - d_in))).astype(bf16)
    x_mft_p = jnp.pad(x_mft, ((0, n_mft_pad - n_mft), (0, d_pad - d_in))).astype(bf16)

    # Dense row-normalized adjacency (mean aggregation), built in f32 for exact
    # degree normalization and stored bf16 for the MXU.  Padded rows/cols are 0,
    # so phantom nodes never contribute.
    counts_match = jnp.zeros((n_mft_pad, n_mch_pad), jnp.float32).at[edge_dst, edge_src].add(1.0)
    deg_mft = counts_match.sum(axis=1, keepdims=True)
    a_match = jnp.where(deg_mft > 0, counts_match / jnp.maximum(deg_mft, 1.0), 0.0).astype(bf16)

    counts_rev = jnp.zeros((n_mch_pad, n_mft_pad), jnp.float32).at[edge_src, edge_dst].add(1.0)
    deg_mch = counts_rev.sum(axis=1, keepdims=True)
    a_rev = jnp.where(deg_mch > 0, counts_rev / jnp.maximum(deg_mch, 1.0), 0.0).astype(bf16)

    # 1. Input projection (dropout == identity in eval mode).
    h_mch = _linear(x_mch_p, pp["w_mch"], pp["b_mch"], tile_m=tile_mch)
    h_mft = _linear(x_mft_p, pp["w_mft"], pp["b_mft"], tile_m=tile_mft)

    # 2. conv1 (ReLU fused into the kernel).
    h1_mft = _sage_conv(a_match, h_mch, h_mft, pp["wl1m"], pp["bl1m"], pp["wr1m"],
                        relu=True, tile_m=tile_mft)
    h1_mch = _sage_conv(a_rev, h_mft, h_mch, pp["wl1r"], pp["bl1r"], pp["wr1r"],
                        relu=True, tile_m=tile_mch)

    # 3. conv2.
    o_mft = _sage_conv(a_match, h1_mch, h1_mft, pp["wl2m"], pp["bl2m"], pp["wr2m"],
                       relu=False, tile_m=tile_mft)
    o_mch = _sage_conv(a_rev, h1_mft, h1_mch, pp["wl2r"], pp["bl2r"], pp["wr2r"],
                       relu=False, tile_m=tile_mch)

    # 4. Per-edge gather as a cheap row gather (no dense one-hot matmuls),
    #    then the tiled edge-classifier kernel.
    e_src = jnp.pad(o_mch[edge_src], ((0, e_pad - e), (0, 0)))
    e_dst = jnp.pad(o_mft[edge_dst], ((0, e_pad - e), (0, 0)))

    out = _edge_mlp(e_src, e_dst, pp["we1a"], pp["we1b"], pp["be1"],
                    pp["we2_row"], pp["be2"], tile_e=tile_e)
    return out[:e, :1]   # slice the lane-dense [E_pad,128] slab down to [E,1]


# ---------------------------------------------------------------------------
# Pure-JAX reference (f32, unpadded) replicating the PyTorch forward (eval mode)
# ---------------------------------------------------------------------------
def _reference_forward(x_mch, x_mft, edge_src, edge_dst, params):
    h_mch = x_mch @ params["w_mch"] + params["b_mch"]
    h_mft = x_mft @ params["w_mft"] + params["b_mft"]

    def sage(a, h_src, h_dst, wl, bl, wr):
        return (a @ h_src) @ wl + bl + h_dst @ wr

    n_mch, n_mft = x_mch.shape[0], x_mft.shape[0]
    counts_match = jnp.zeros((n_mft, n_mch)).at[edge_dst, edge_src].add(1.0)
    deg_mft = counts_match.sum(1, keepdims=True)
    a_match = jnp.where(deg_mft > 0, counts_match / jnp.maximum(deg_mft, 1.0), 0.0)
    counts_rev = jnp.zeros((n_mch, n_mft)).at[edge_src, edge_dst].add(1.0)
    deg_mch = counts_rev.sum(1, keepdims=True)
    a_rev = jnp.where(deg_mch > 0, counts_rev / jnp.maximum(deg_mch, 1.0), 0.0)

    o_mft = sage(a_match, h_mch, h_mft, params["wl1m"], params["bl1m"], params["wr1m"])
    o_mch = sage(a_rev, h_mft, h_mch, params["wl1r"], params["bl1r"], params["wr1r"])
    h_mft, h_mch = jax.nn.relu(o_mft), jax.nn.relu(o_mch)
    o_mft = sage(a_match, h_mch, h_mft, params["wl2m"], params["bl2m"], params["wr2m"])
    o_mch = sage(a_rev, h_mft, h_mch, params["wl2r"], params["bl2r"], params["wr2r"])

    e_in = jnp.concatenate([o_mch[edge_src], o_mft[edge_dst]], axis=1)
    we1 = jnp.concatenate([params["we1a"], params["we1b"]], axis=0)
    hidden = jax.nn.relu(e_in @ we1 + params["be1"])
    return jax.nn.sigmoid(hidden @ params["we2"] + params["be2"])


def init_params(key, input_dim, hidden_dim):
    shapes = {
        "w_mch": (input_dim, hidden_dim), "b_mch": (1, hidden_dim),
        "w_mft": (input_dim, hidden_dim), "b_mft": (1, hidden_dim),
        "wl1m": (hidden_dim, hidden_dim), "bl1m": (1, hidden_dim),
        "wr1m": (hidden_dim, hidden_dim),
        "wl1r": (hidden_dim, hidden_dim), "bl1r": (1, hidden_dim),
        "wr1r": (hidden_dim, hidden_dim),
        "wl2m": (hidden_dim, hidden_dim), "bl2m": (1, hidden_dim),
        "wr2m": (hidden_dim, hidden_dim),
        "wl2r": (hidden_dim, hidden_dim), "bl2r": (1, hidden_dim),
        "wr2r": (hidden_dim, hidden_dim),
        "we1a": (hidden_dim, hidden_dim), "we1b": (hidden_dim, hidden_dim),
        "be1": (1, hidden_dim), "we2": (hidden_dim, 1),
    }
    keys = jax.random.split(key, len(shapes))   # one key per parameter (no reuse)
    params = {name: (0.1 * jax.random.normal(k, shape)).astype(jnp.float32)
              for (name, shape), k in zip(shapes.items(), keys)}
    params["be2"] = jnp.zeros((1, 1), jnp.float32)
    return params


if __name__ == "__main__":
    INPUT_DIM, HIDDEN_DIM = 5, 64
    N_MCH, N_MFT, N_EDGES = 16, 16, 24

    key = jax.random.PRNGKey(0)
    k_xm, k_xf, k_es, k_ed, k_p = jax.random.split(key, 5)

    x_mch = jax.random.normal(k_xm, (N_MCH, INPUT_DIM), jnp.float32)
    x_mft = jax.random.normal(k_xf, (N_MFT, INPUT_DIM), jnp.float32)
    edge_src = jax.random.randint(k_es, (N_EDGES,), 0, N_MCH)
    edge_dst = jax.random.randint(k_ed, (N_EDGES,), 0, N_MFT)

    params = init_params(k_p, INPUT_DIM, HIDDEN_DIM)

    out = basic_gnn_forward(x_mch, x_mft, edge_src, edge_dst, params)
    out = jax.block_until_ready(out)

    ref = _reference_forward(x_mch, x_mft, edge_src, edge_dst, params)
    assert out.shape == (N_EDGES, 1)
    max_err = float(jnp.max(jnp.abs(out - ref)))
    # bf16 matmul operands (f32 accumulation) vs the f32 reference.
    assert max_err < 2e-2, f"mismatch vs JAX reference (max abs err {max_err})"

    print("KERNEL_OK")
</pallas_src>

<mosaic_0001>
module attributes {stable_mosaic.version = 11 : i64} {
  func.func @linear_kernel(%arg0: i32, %arg1: memref<16x8xbf16, #tpu.memory_space<vmem>>, %arg2: memref<8x128xbf16, #tpu.memory_space<vmem>>, %arg3: memref<1x128xf32, #tpu.memory_space<vmem>>, %arg4: memref<16x128xbf16, #tpu.memory_space<vmem>>) attributes {dimension_semantics = [#tpu.dimension_semantics<parallel>], iteration_bounds = array<i64: 1>, scalar_prefetch = 0 : i64, scratch_operands = 0 : i64, tpu.core_type = #tpu.core_type<tc>, window_params = [{transform_indices = @transform_0, window_bounds = array<i64: 16, 8>}, {pipeline_mode = #tpu.pipeline_mode<synchronous>, transform_indices = @transform_1, window_bounds = array<i64: 8, 128>}, {pipeline_mode = #tpu.pipeline_mode<synchronous>, transform_indices = @transform_2, window_bounds = array<i64: 1, 128>}, {transform_indices = @transform_3, window_bounds = array<i64: 16, 128>}]} {
    %c0 = arith.constant 0 : index
    %c0_0 = arith.constant 0 : index
    %0 = vector.load %arg1[%c0, %c0_0] : memref<16x8xbf16, #tpu.memory_space<vmem>>, vector<16x8xbf16>
    %c0_1 = arith.constant 0 : index
    %c0_2 = arith.constant 0 : index
    %1 = vector.load %arg2[%c0_1, %c0_2] : memref<8x128xbf16, #tpu.memory_space<vmem>>, vector<8x128xbf16>
    %cst = arith.constant dense<0.000000e+00> : vector<16x128xf32>
    %2 = tpu.matmul %0, %1, %cst {dimension_numbers = #tpu.dot_dimension_numbers<[1], [0], [0], [1], [0, 0, 1, 1], [], []>} : vector<16x8xbf16>, vector<8x128xbf16>, vector<16x128xf32> -> vector<16x128xf32>
    %c0_3 = arith.constant 0 : index
    %c0_4 = arith.constant 0 : index
    %3 = vector.load %arg3[%c0_3, %c0_4] : memref<1x128xf32, #tpu.memory_space<vmem>>, vector<1x128xf32>
    %4 = vector.broadcast %3 : vector<1x128xf32> to vector<16x128xf32>
    %5 = arith.addf %2, %4 : vector<16x128xf32>
    %6 = arith.truncf %5 : vector<16x128xf32> to vector<16x128xbf16>
    %c0_5 = arith.constant 0 : index
    %c0_6 = arith.constant 0 : index
    %7 = vector.load %arg4[%c0_5, %c0_6] : memref<16x128xbf16, #tpu.memory_space<vmem>>, vector<16x128xbf16>
    tpu.vector_store %arg4[%c0_5, %c0_6], %6 {strides = array<i32>} : memref<16x128xbf16, #tpu.memory_space<vmem>>, vector<16x128xbf16>,
    return
  }
  func.func @transform_0(%arg0: i32) -> (i32, i32) {
    %c0_i32 = arith.constant 0 : i32
    %c0_i32_0 = arith.constant 0 : i32
    return %arg0, %c0_i32 : i32, i32
  }
  func.func @transform_1(%arg0: i32) -> (i32, i32) {
    %c0_i32 = arith.constant 0 : i32
    %c0_i32_0 = arith.constant 0 : i32
    %c0_i32_1 = arith.constant 0 : i32
    return %c0_i32, %c0_i32_0 : i32, i32
  }
  func.func @transform_2(%arg0: i32) -> (i32, i32) {
    %c0_i32 = arith.constant 0 : i32
    %c0_i32_0 = arith.constant 0 : i32
    %c0_i32_1 = arith.constant 0 : i32
    return %c0_i32, %c0_i32_0 : i32, i32
  }
  func.func @transform_3(%arg0: i32) -> (i32, i32) {
    %c0_i32 = arith.constant 0 : i32
    %c0_i32_0 = arith.constant 0 : i32
    return %arg0, %c0_i32 : i32, i32
  }
}

</mosaic_0001>

<bundles_post_ra>
// kernel: tpu_custom_call.1
= control target key start
LH: loop header
LB: loop body
LE: loop exit
PB: predicated region body
PF: predicated region fallthrough
CT: control target
= control target key end

     0   :  { %vm35_vm0 = vcmask 1043456   ;;  %v154_v1 = vmov 0.0   ;;  %vm155_vm1 = vmmov 0   ;;  %vm31_vm2 = vcmask 64512   ;;  %s191_s0 = inlined_call_operand.vmem [shape: bf16[16,8], index: 0, kind: input, shape index: {}]   ;;  %s192_s1 = inlined_call_operand.vmem [shape: bf16[8,128], index: 1, kind: input, shape index: {}]   ;;  %s193_s2 = inlined_call_operand.vmem [shape: f32[1,128], index: 2, kind: input, shape index: {}]   ;;  %s194_s3 = inlined_call_operand.hbm [shape: bf16[16,128], index: 3, kind: output, shape index: {}]  }
   0x1   :  { %v18_v0 = vld [vmem:[%s192_s1] sm:$0xf]  ;;  %120 = vmatprep.subr.bf16.mxu0 %v154_v1  ;;  %122 = vmatprep.mubr.msk.bf16.mxu0 %vm155_vm1, %v154_v1 }
   0x2   :  { %v37_v2 = vsel %vm35_vm0, %v18_v0, 0  ;;  %v131_v3 = vld [vmem:[%s191_s0] sm:$0xff]  }
   0x3   :  { %121 = vmatpush3.bf16.msra.mxu0 %v37_v2 }
   0x4   :  { %8 = vsyncpa [#allocation3], 0  ;;  %v106_v5 = vld [vmem:[%s193_s2] ss:$0 sm:$0xff]  ;;  %s156_s1 = smov [#allocation2]  }
   0x5   :  { %s95_s18 = sshll.u32 %s156_s1, 4  ;;  %s96_s18 = int_to_ptr.vmem [resolvable:$true] %s95_s18 }
   0x6   :  { %123 = vmatmul.mubr.msk.bf16.vlgmr.msra.gmra.mxu0 %vm31_vm2, %v131_v3  ;;  %s132_s0 = scalar_lea.vmem %s96_s18, 128  ;;  %p137_p1 = scmp.lt.s32.totalorder %s96_s18, %s96_s18 }
   0x7   :  { %p133_p0 = scmp.ne.s32.totalorder %s96_s18, %s132_s0  ;;  %p138_p2 = scmp.lt.s32.totalorder %s132_s0, %s132_s0 }
   0x9   :  { %p139_p3 = por %p138_p2, %p137_p1 }
   0xb   :  { %p140_p4 = pnand %p139_p3, %p133_p0 }
  0xc6   :  { %v73_v4 = vpop.f32.mrf.mxu0 }
  0xc7   :  { %v74_v8 = vadd.f32 %v106_v5, %v73_v4 }
  0xc8   :  { %v124_v6 = vpop.f32.mrf.mxu0 }
  0xca   :  { %v76_v7 = vpop.f32.mrf.mxu0 }
  0xcb   :  { %v77_v9 = vadd.f32 %v106_v5, %v76_v7 }
  0xcc   :  { %v125_v10 = vpop.f32.mrf.mxu0 }
  0xcd   :  { %v116_v11 = vpack.c.bf16 %v77_v9, %v74_v8 }
  0xcf   :  { %117 = vst [vmem:[#allocation2] sm:$0xff] %v116_v11  }
  0xd0   :  { %143 = shalt.err (!%p140_p4)
}
  0xd1   :  { %s157_s19 = smov 64   ;;  %s158_s20 = smov 4  }
  0xd2   :  { %101 = dma.vmem_to_hbm [thread:$0]  %s96_s18, 128, %s194_s3, [#allocation3], %s157_s19, %s157_s19, %s158_s20  }
  0xd3   :  { %152 = dma.done.wait [#allocation3], 128  }
  0xd4   :  { %153 = vsyncadd [#allocation3], 4294967168 }
  0xd5   :  { %105 = vsyncpa [#allocation3], 1 }

</bundles_post_ra>
